<compile_context>
chip_gen: v6e
topology: v6e:2x2x1
jax: 0.10.0
libtpu: 0.0.40
codegen_flags: <defaults>
</compile_context>

<pallas_src>
import jax
import jax.numpy as jnp
import numpy as np
from jax import lax
from jax.experimental import pallas as pl
from jax.experimental.pallas import tpu as pltpu


def _output_projection_kernel(w_ref, b_ref, x_ref, o_ref):
    """1x1 conv as per-output-channel scalar-operand FMAs.

    w_ref: SMEM (Cout*Cin,) f32, flattened nn.Conv2d weight, index = co*Cin + c
    b_ref: SMEM (Cout,)     f32
    x_ref: VMEM (Bt, Cin, Lt)   flattened-spatial on the lane axis
    o_ref: VMEM (Bt, Cout, Lt)
    """
    Cin = x_ref.shape[1]
    Cout = o_ref.shape[1]

    x = x_ref[...].astype(jnp.float32)            # (Bt, Cin, Lt)

    cols = []
    for co in range(Cout):
        # Bias folded into the first MAC -> no separate bias pass.
        acc = x[:, 0:1, :] * w_ref[co * Cin + 0] + b_ref[co]      # (Bt, 1, Lt)
        for c in range(1, Cin):
            acc = acc + x[:, c:c + 1, :] * w_ref[co * Cin + c]
        cols.append(acc)

    # Single full-width, lane-dense store of the whole output tile.
    o_ref[...] = jnp.concatenate(cols, axis=1).astype(o_ref.dtype)


def _xla_output_projection(x_nchw, weight, bias):
    """Plain-XLA fallback (small shapes / un-tileable layouts)."""
    y = lax.conv_general_dilated(
        x_nchw.astype(jnp.float32), weight.astype(jnp.float32),
        window_strides=(1, 1), padding="VALID",
        dimension_numbers=("NCHW", "OIHW", "NCHW"))
    y = y + bias.astype(jnp.float32).reshape(1, -1, 1, 1)
    return y.astype(x_nchw.dtype)


def output_projection(x_nchw, weight, bias, *, force_pallas=False):
    """Pallas forward of OutputProjection.  NCHW in, NCHW out.

    weight: (Cout, Cin, 1, 1) like nn.Conv2d; bias: (Cout,).
    """
    N, Cin, H, W = x_nchw.shape
    Cout = weight.shape[0]
    HW = H * W
    itemsize = jnp.dtype(x_nchw.dtype).itemsize

    # ---- small-shape bypass: a standalone Pallas call is pure launch overhead
    #      here; XLA will do (and fuse) the 1x1 conv for free. ----
    total_bytes = (N * Cin * HW + N * Cout * HW) * itemsize
    if (not force_pallas) and total_bytes < (1 << 20):
        return _xla_output_projection(x_nchw, weight, bias)

    x = x_nchw.reshape(N, Cin, HW)                                 # free reshape
    # Flat scalar tables for SMEM; index = co*Cin + c.
    w_flat = weight.reshape(Cout, Cin).reshape(-1).astype(jnp.float32)
    b_flat = bias.reshape(-1).astype(jnp.float32)

    # ---- tile-size heuristic (accounts for (8,128) padding + dtype) ----
    def _rup(v, m):
        return (v + m - 1) // m * m

    def blk_bytes(bt, lt):                  # double-buffered in + out blocks
        in_b = bt * _rup(Cin, 8) * _rup(lt, 128) * itemsize
        out_b = bt * _rup(Cout, 8) * _rup(lt, 128) * itemsize
        return 2 * (in_b + out_b)

    # Generation-aware VMEM budget: big tiles on v5e/v6e (128 MiB physical),
    # capped on v7x (64 MiB per core).
    try:
        vmem_cap = int(pltpu.get_tpu_info().vmem_capacity_bytes)
    except Exception:
        vmem_cap = 64 << 20                 # conservative (v7x) fallback
    budget = max(4 << 20, min(vmem_cap // 4, 32 << 20))

    b_tile, l_tile = N, HW
    lane_ok = (HW % 128 == 0)
    if lane_ok:
        while blk_bytes(b_tile, l_tile) > budget and l_tile % 256 == 0:
            l_tile //= 2
    while blk_bytes(b_tile, l_tile) > budget and b_tile % 2 == 0:
        b_tile //= 2

    if blk_bytes(b_tile, l_tile) > budget and not force_pallas:
        # Un-tileable within budget (odd N, ragged HW): let XLA handle it
        # instead of risking a scoped-VMEM compile failure.
        return _xla_output_projection(x_nchw, weight, bias)

    # Guarantee >= 2 steps along a parallel axis so v7x's 2nd TensorCore gets
    # work — but only when per-step work comfortably exceeds the ~0.35us step
    # overhead (skip for tiny inputs like the toy test shape).
    if (N // b_tile) * (HW // l_tile) == 1:
        if lane_ok and l_tile % 256 == 0 and l_tile >= 2048:
            l_tile //= 2
        elif b_tile % 2 == 0 and HW >= 2048:
            b_tile //= 2

    grid = (N // b_tile, HW // l_tile)
    vmem_limit = int(min(vmem_cap * 3 // 4,
                         max(32 << 20, blk_bytes(b_tile, l_tile) + (8 << 20))))

    out = pl.pallas_call(
        _output_projection_kernel,
        out_shape=jax.ShapeDtypeStruct((N, Cout, HW), x.dtype),
        grid=grid,
        in_specs=[
            pl.BlockSpec(memory_space=pltpu.MemorySpace.SMEM),     # weights
            pl.BlockSpec(memory_space=pltpu.MemorySpace.SMEM),     # bias
            pl.BlockSpec((b_tile, Cin, l_tile), lambda bi, li: (bi, 0, li)),
        ],
        out_specs=pl.BlockSpec((b_tile, Cout, l_tile), lambda bi, li: (bi, 0, li)),
        compiler_params=pltpu.CompilerParams(
            dimension_semantics=("parallel", "parallel"),
            vmem_limit_bytes=vmem_limit),
    )(w_flat, b_flat, x)

    return out.reshape(N, Cout, H, W)                              # free reshape


def ref_output_projection(x_nchw, weight, bias):
    """Pure-JAX reference (same math via lax.conv_general_dilated)."""
    y = lax.conv_general_dilated(
        x_nchw.astype(jnp.float32), weight.astype(jnp.float32),
        window_strides=(1, 1), padding="VALID",
        dimension_numbers=("NCHW", "OIHW", "NCHW"))
    return y + bias.reshape(1, -1, 1, 1)


if __name__ == "__main__":
    key = jax.random.PRNGKey(0)
    kx, kw, kb = jax.random.split(key, 3)

    N, in_ch, out_ch, H, W = 2, 4, 8, 16, 16

    x = jax.random.normal(kx, (N, in_ch, H, W), jnp.float32)        # NCHW
    weight = 0.1 * jax.random.normal(kw, (out_ch, in_ch, 1, 1), jnp.float32)
    bias = 0.1 * jax.random.normal(kb, (out_ch,), jnp.float32)

    ref = jax.block_until_ready(ref_output_projection(x, weight, bias))

    # Pallas path (forced: the toy shape would otherwise take the XLA bypass).
    out = jax.block_until_ready(output_projection(x, weight, bias, force_pallas=True))
    assert out.shape == (N, out_ch, H, W), out.shape
    np.testing.assert_allclose(np.asarray(out), np.asarray(ref), rtol=1e-5, atol=1e-5)

    # Default path (small-shape XLA bypass) must match too.
    out_bypass = jax.block_until_ready(output_projection(x, weight, bias))
    np.testing.assert_allclose(np.asarray(out_bypass), np.asarray(ref),
                               rtol=1e-5, atol=1e-5)

    print("KERNEL_OK")
</pallas_src>

<mosaic_0001>
module attributes {stable_mosaic.version = 11 : i64} {
  func.func @_output_projection_kernel(%arg0: i32, %arg1: i32, %arg2: memref<32xf32, #tpu.memory_space<smem>>, %arg3: memref<8xf32, #tpu.memory_space<smem>>, %arg4: memref<2x4x256xf32, #tpu.memory_space<vmem>>, %arg5: memref<2x8x256xf32, #tpu.memory_space<vmem>>) attributes {dimension_semantics = [#tpu.dimension_semantics<parallel>, #tpu.dimension_semantics<parallel>], iteration_bounds = array<i64: 1, 1>, scalar_prefetch = 0 : i64, scratch_operands = 0 : i64, tpu.core_type = #tpu.core_type<tc>, window_params = [{transform_indices = @transform_0, window_bounds = array<i64: 32>}, {transform_indices = @transform_1, window_bounds = array<i64: 8>}, {transform_indices = @transform_2, window_bounds = array<i64: 2, 4, 256>}, {transform_indices = @transform_3, window_bounds = array<i64: 2, 8, 256>}]} {
    %c0 = arith.constant 0 : index
    %c0_0 = arith.constant 0 : index
    %c0_1 = arith.constant 0 : index
    %0 = vector.load %arg4[%c0, %c0_0, %c0_1] : memref<2x4x256xf32, #tpu.memory_space<vmem>>, vector<2x4x256xf32>
    %1 = vector.extract_strided_slice %0 {offsets = [0, 0, 0], sizes = [2, 1, 256], strides = [1, 1, 1]} : vector<2x4x256xf32> to vector<2x1x256xf32>
    %c0_2 = arith.constant 0 : index
    %2 = memref.load %arg2[%c0_2] : memref<32xf32, #tpu.memory_space<smem>>
    %3 = vector.broadcast %2 : f32 to vector<2x1x256xf32>
    %4 = arith.mulf %1, %3 : vector<2x1x256xf32>
    %c0_3 = arith.constant 0 : index
    %5 = memref.load %arg3[%c0_3] : memref<8xf32, #tpu.memory_space<smem>>
    %6 = vector.broadcast %5 : f32 to vector<2x1x256xf32>
    %7 = arith.addf %4, %6 : vector<2x1x256xf32>
    %8 = vector.extract_strided_slice %0 {offsets = [0, 1, 0], sizes = [2, 1, 256], strides = [1, 1, 1]} : vector<2x4x256xf32> to vector<2x1x256xf32>
    %c1 = arith.constant 1 : index
    %9 = memref.load %arg2[%c1] : memref<32xf32, #tpu.memory_space<smem>>
    %10 = vector.broadcast %9 : f32 to vector<2x1x256xf32>
    %11 = arith.mulf %8, %10 : vector<2x1x256xf32>
    %12 = arith.addf %7, %11 : vector<2x1x256xf32>
    %13 = vector.extract_strided_slice %0 {offsets = [0, 2, 0], sizes = [2, 1, 256], strides = [1, 1, 1]} : vector<2x4x256xf32> to vector<2x1x256xf32>
    %c2 = arith.constant 2 : index
    %14 = memref.load %arg2[%c2] : memref<32xf32, #tpu.memory_space<smem>>
    %15 = vector.broadcast %14 : f32 to vector<2x1x256xf32>
    %16 = arith.mulf %13, %15 : vector<2x1x256xf32>
    %17 = arith.addf %12, %16 : vector<2x1x256xf32>
    %18 = vector.extract_strided_slice %0 {offsets = [0, 3, 0], sizes = [2, 1, 256], strides = [1, 1, 1]} : vector<2x4x256xf32> to vector<2x1x256xf32>
    %c3 = arith.constant 3 : index
    %19 = memref.load %arg2[%c3] : memref<32xf32, #tpu.memory_space<smem>>
    %20 = vector.broadcast %19 : f32 to vector<2x1x256xf32>
    %21 = arith.mulf %18, %20 : vector<2x1x256xf32>
    %22 = arith.addf %17, %21 : vector<2x1x256xf32>
    %23 = vector.extract_strided_slice %0 {offsets = [0, 0, 0], sizes = [2, 1, 256], strides = [1, 1, 1]} : vector<2x4x256xf32> to vector<2x1x256xf32>
    %c4 = arith.constant 4 : index
    %24 = memref.load %arg2[%c4] : memref<32xf32, #tpu.memory_space<smem>>
    %25 = vector.broadcast %24 : f32 to vector<2x1x256xf32>
    %26 = arith.mulf %23, %25 : vector<2x1x256xf32>
    %c1_4 = arith.constant 1 : index
    %27 = memref.load %arg3[%c1_4] : memref<8xf32, #tpu.memory_space<smem>>
    %28 = vector.broadcast %27 : f32 to vector<2x1x256xf32>
    %29 = arith.addf %26, %28 : vector<2x1x256xf32>
    %30 = vector.extract_strided_slice %0 {offsets = [0, 1, 0], sizes = [2, 1, 256], strides = [1, 1, 1]} : vector<2x4x256xf32> to vector<2x1x256xf32>
    %c5 = arith.constant 5 : index
    %31 = memref.load %arg2[%c5] : memref<32xf32, #tpu.memory_space<smem>>
    %32 = vector.broadcast %31 : f32 to vector<2x1x256xf32>
    %33 = arith.mulf %30, %32 : vector<2x1x256xf32>
    %34 = arith.addf %29, %33 : vector<2x1x256xf32>
    %35 = vector.extract_strided_slice %0 {offsets = [0, 2, 0], sizes = [2, 1, 256], strides = [1, 1, 1]} : vector<2x4x256xf32> to vector<2x1x256xf32>
    %c6 = arith.constant 6 : index
    %36 = memref.load %arg2[%c6] : memref<32xf32, #tpu.memory_space<smem>>
    %37 = vector.broadcast %36 : f32 to vector<2x1x256xf32>
    %38 = arith.mulf %35, %37 : vector<2x1x256xf32>
    %39 = arith.addf %34, %38 : vector<2x1x256xf32>
    %40 = vector.extract_strided_slice %0 {offsets = [0, 3, 0], sizes = [2, 1, 256], strides = [1, 1, 1]} : vector<2x4x256xf32> to vector<2x1x256xf32>
    %c7 = arith.constant 7 : index
    %41 = memref.load %arg2[%c7] : memref<32xf32, #tpu.memory_space<smem>>
    %42 = vector.broadcast %41 : f32 to vector<2x1x256xf32>
    %43 = arith.mulf %40, %42 : vector<2x1x256xf32>
    %44 = arith.addf %39, %43 : vector<2x1x256xf32>
    %45 = vector.extract_strided_slice %0 {offsets = [0, 0, 0], sizes = [2, 1, 256], strides = [1, 1, 1]} : vector<2x4x256xf32> to vector<2x1x256xf32>
    %c8 = arith.constant 8 : index
    %46 = memref.load %arg2[%c8] : memref<32xf32, #tpu.memory_space<smem>>
    %47 = vector.broadcast %46 : f32 to vector<2x1x256xf32>
    %48 = arith.mulf %45, %47 : vector<2x1x256xf32>
    %c2_5 = arith.constant 2 : index
    %49 = memref.load %arg3[%c2_5] : memref<8xf32, #tpu.memory_space<smem>>
    %50 = vector.broadcast %49 : f32 to vector<2x1x256xf32>
    %51 = arith.addf %48, %50 : vector<2x1x256xf32>
    %52 = vector.extract_strided_slice %0 {offsets = [0, 1, 0], sizes = [2, 1, 256], strides = [1, 1, 1]} : vector<2x4x256xf32> to vector<2x1x256xf32>
    %c9 = arith.constant 9 : index
    %53 = memref.load %arg2[%c9] : memref<32xf32, #tpu.memory_space<smem>>
    %54 = vector.broadcast %53 : f32 to vector<2x1x256xf32>
    %55 = arith.mulf %52, %54 : vector<2x1x256xf32>
    %56 = arith.addf %51, %55 : vector<2x1x256xf32>
    %57 = vector.extract_strided_slice %0 {offsets = [0, 2, 0], sizes = [2, 1, 256], strides = [1, 1, 1]} : vector<2x4x256xf32> to vector<2x1x256xf32>
    %c10 = arith.constant 10 : index
    %58 = memref.load %arg2[%c10] : memref<32xf32, #tpu.memory_space<smem>>
    %59 = vector.broadcast %58 : f32 to vector<2x1x256xf32>
    %60 = arith.mulf %57, %59 : vector<2x1x256xf32>
    %61 = arith.addf %56, %60 : vector<2x1x256xf32>
    %62 = vector.extract_strided_slice %0 {offsets = [0, 3, 0], sizes = [2, 1, 256], strides = [1, 1, 1]} : vector<2x4x256xf32> to vector<2x1x256xf32>
    %c11 = arith.constant 11 : index
    %63 = memref.load %arg2[%c11] : memref<32xf32, #tpu.memory_space<smem>>
    %64 = vector.broadcast %63 : f32 to vector<2x1x256xf32>
    %65 = arith.mulf %62, %64 : vector<2x1x256xf32>
    %66 = arith.addf %61, %65 : vector<2x1x256xf32>
    %67 = vector.extract_strided_slice %0 {offsets = [0, 0, 0], sizes = [2, 1, 256], strides = [1, 1, 1]} : vector<2x4x256xf32> to vector<2x1x256xf32>
    %c12 = arith.constant 12 : index
    %68 = memref.load %arg2[%c12] : memref<32xf32, #tpu.memory_space<smem>>
    %69 = vector.broadcast %68 : f32 to vector<2x1x256xf32>
    %70 = arith.mulf %67, %69 : vector<2x1x256xf32>
    %c3_6 = arith.constant 3 : index
    %71 = memref.load %arg3[%c3_6] : memref<8xf32, #tpu.memory_space<smem>>
    %72 = vector.broadcast %71 : f32 to vector<2x1x256xf32>
    %73 = arith.addf %70, %72 : vector<2x1x256xf32>
    %74 = vector.extract_strided_slice %0 {offsets = [0, 1, 0], sizes = [2, 1, 256], strides = [1, 1, 1]} : vector<2x4x256xf32> to vector<2x1x256xf32>
    %c13 = arith.constant 13 : index
    %75 = memref.load %arg2[%c13] : memref<32xf32, #tpu.memory_space<smem>>
    %76 = vector.broadcast %75 : f32 to vector<2x1x256xf32>
    %77 = arith.mulf %74, %76 : vector<2x1x256xf32>
    %78 = arith.addf %73, %77 : vector<2x1x256xf32>
    %79 = vector.extract_strided_slice %0 {offsets = [0, 2, 0], sizes = [2, 1, 256], strides = [1, 1, 1]} : vector<2x4x256xf32> to vector<2x1x256xf32>
    %c14 = arith.constant 14 : index
    %80 = memref.load %arg2[%c14] : memref<32xf32, #tpu.memory_space<smem>>
    %81 = vector.broadcast %80 : f32 to vector<2x1x256xf32>
    %82 = arith.mulf %79, %81 : vector<2x1x256xf32>
    %83 = arith.addf %78, %82 : vector<2x1x256xf32>
    %84 = vector.extract_strided_slice %0 {offsets = [0, 3, 0], sizes = [2, 1, 256], strides = [1, 1, 1]} : vector<2x4x256xf32> to vector<2x1x256xf32>
    %c15 = arith.constant 15 : index
    %85 = memref.load %arg2[%c15] : memref<32xf32, #tpu.memory_space<smem>>
    %86 = vector.broadcast %85 : f32 to vector<2x1x256xf32>
    %87 = arith.mulf %84, %86 : vector<2x1x256xf32>
    %88 = arith.addf %83, %87 : vector<2x1x256xf32>
    %89 = vector.extract_strided_slice %0 {offsets = [0, 0, 0], sizes = [2, 1, 256], strides = [1, 1, 1]} : vector<2x4x256xf32> to vector<2x1x256xf32>
    %c16 = arith.constant 16 : index
    %90 = memref.load %arg2[%c16] : memref<32xf32, #tpu.memory_space<smem>>
    %91 = vector.broadcast %90 : f32 to vector<2x1x256xf32>
    %92 = arith.mulf %89, %91 : vector<2x1x256xf32>
    %c4_7 = arith.constant 4 : index
    %93 = memref.load %arg3[%c4_7] : memref<8xf32, #tpu.memory_space<smem>>
    %94 = vector.broadcast %93 : f32 to vector<2x1x256xf32>
    %95 = arith.addf %92, %94 : vector<2x1x256xf32>
    %96 = vector.extract_strided_slice %0 {offsets = [0, 1, 0], sizes = [2, 1, 256], strides = [1, 1, 1]} : vector<2x4x256xf32> to vector<2x1x256xf32>
    %c17 = arith.constant 17 : index
    %97 = memref.load %arg2[%c17] : memref<32xf32, #tpu.memory_space<smem>>
    %98 = vector.broadcast %97 : f32 to vector<2x1x256xf32>
    %99 = arith.mulf %96, %98 : vector<2x1x256xf32>
    %100 = arith.addf %95, %99 : vector<2x1x256xf32>
    %101 = vector.extract_strided_slice %0 {offsets = [0, 2, 0], sizes = [2, 1, 256], strides = [1, 1, 1]} : vector<2x4x256xf32> to vector<2x1x256xf32>
    %c18 = arith.constant 18 : index
    %102 = memref.load %arg2[%c18] : memref<32xf32, #tpu.memory_space<smem>>
    %103 = vector.broadcast %102 : f32 to vector<2x1x256xf32>
    %104 = arith.mulf %101, %103 : vector<2x1x256xf32>
    %105 = arith.addf %100, %104 : vector<2x1x256xf32>
    %106 = vector.extract_strided_slice %0 {offsets = [0, 3, 0], sizes = [2, 1, 256], strides = [1, 1, 1]} : vector<2x4x256xf32> to vector<2x1x256xf32>
    %c19 = arith.constant 19 : index
    %107 = memref.load %arg2[%c19] : memref<32xf32, #tpu.memory_space<smem>>
    %108 = vector.broadcast %107 : f32 to vector<2x1x256xf32>
    %109 = arith.mulf %106, %108 : vector<2x1x256xf32>
    %110 = arith.addf %105, %109 : vector<2x1x256xf32>
    %111 = vector.extract_strided_slice %0 {offsets = [0, 0, 0], sizes = [2, 1, 256], strides = [1, 1, 1]} : vector<2x4x256xf32> to vector<2x1x256xf32>
    %c20 = arith.constant 20 : index
    %112 = memref.load %arg2[%c20] : memref<32xf32, #tpu.memory_space<smem>>
    %113 = vector.broadcast %112 : f32 to vector<2x1x256xf32>
    %114 = arith.mulf %111, %113 : vector<2x1x256xf32>
    %c5_8 = arith.constant 5 : index
    %115 = memref.load %arg3[%c5_8] : memref<8xf32, #tpu.memory_space<smem>>
    %116 = vector.broadcast %115 : f32 to vector<2x1x256xf32>
    %117 = arith.addf %114, %116 : vector<2x1x256xf32>
    %118 = vector.extract_strided_slice %0 {offsets = [0, 1, 0], sizes = [2, 1, 256], strides = [1, 1, 1]} : vector<2x4x256xf32> to vector<2x1x256xf32>
    %c21 = arith.constant 21 : index
    %119 = memref.load %arg2[%c21] : memref<32xf32, #tpu.memory_space<smem>>
    %120 = vector.broadcast %119 : f32 to vector<2x1x256xf32>
    %121 = arith.mulf %118, %120 : vector<2x1x256xf32>
    %122 = arith.addf %117, %121 : vector<2x1x256xf32>
    %123 = vector.extract_strided_slice %0 {offsets = [0, 2, 0], sizes = [2, 1, 256], strides = [1, 1, 1]} : vector<2x4x256xf32> to vector<2x1x256xf32>
    %c22 = arith.constant 22 : index
    %124 = memref.load %arg2[%c22] : memref<32xf32, #tpu.memory_space<smem>>
    %125 = vector.broadcast %124 : f32 to vector<2x1x256xf32>
    %126 = arith.mulf %123, %125 : vector<2x1x256xf32>
    %127 = arith.addf %122, %126 : vector<2x1x256xf32>
    %128 = vector.extract_strided_slice %0 {offsets = [0, 3, 0], sizes = [2, 1, 256], strides = [1, 1, 1]} : vector<2x4x256xf32> to vector<2x1x256xf32>
    %c23 = arith.constant 23 : index
    %129 = memref.load %arg2[%c23] : memref<32xf32, #tpu.memory_space<smem>>
    %130 = vector.broadcast %129 : f32 to vector<2x1x256xf32>
    %131 = arith.mulf %128, %130 : vector<2x1x256xf32>
    %132 = arith.addf %127, %131 : vector<2x1x256xf32>
    %133 = vector.extract_strided_slice %0 {offsets = [0, 0, 0], sizes = [2, 1, 256], strides = [1, 1, 1]} : vector<2x4x256xf32> to vector<2x1x256xf32>
    %c24 = arith.constant 24 : index
    %134 = memref.load %arg2[%c24] : memref<32xf32, #tpu.memory_space<smem>>
    %135 = vector.broadcast %134 : f32 to vector<2x1x256xf32>
    %136 = arith.mulf %133, %135 : vector<2x1x256xf32>
    %c6_9 = arith.constant 6 : index
    %137 = memref.load %arg3[%c6_9] : memref<8xf32, #tpu.memory_space<smem>>
    %138 = vector.broadcast %137 : f32 to vector<2x1x256xf32>
    %139 = arith.addf %136, %138 : vector<2x1x256xf32>
    %140 = vector.extract_strided_slice %0 {offsets = [0, 1, 0], sizes = [2, 1, 256], strides = [1, 1, 1]} : vector<2x4x256xf32> to vector<2x1x256xf32>
    %c25 = arith.constant 25 : index
    %141 = memref.load %arg2[%c25] : memref<32xf32, #tpu.memory_space<smem>>
    %142 = vector.broadcast %141 : f32 to vector<2x1x256xf32>
    %143 = arith.mulf %140, %142 : vector<2x1x256xf32>
    %144 = arith.addf %139, %143 : vector<2x1x256xf32>
    %145 = vector.extract_strided_slice %0 {offsets = [0, 2, 0], sizes = [2, 1, 256], strides = [1, 1, 1]} : vector<2x4x256xf32> to vector<2x1x256xf32>
    %c26 = arith.constant 26 : index
    %146 = memref.load %arg2[%c26] : memref<32xf32, #tpu.memory_space<smem>>
    %147 = vector.broadcast %146 : f32 to vector<2x1x256xf32>
    %148 = arith.mulf %145, %147 : vector<2x1x256xf32>
    %149 = arith.addf %144, %148 : vector<2x1x256xf32>
    %150 = vector.extract_strided_slice %0 {offsets = [0, 3, 0], sizes = [2, 1, 256], strides = [1, 1, 1]} : vector<2x4x256xf32> to vector<2x1x256xf32>
    %c27 = arith.constant 27 : index
    %151 = memref.load %arg2[%c27] : memref<32xf32, #tpu.memory_space<smem>>
    %152 = vector.broadcast %151 : f32 to vector<2x1x256xf32>
    %153 = arith.mulf %150, %152 : vector<2x1x256xf32>
    %154 = arith.addf %149, %153 : vector<2x1x256xf32>
    %155 = vector.extract_strided_slice %0 {offsets = [0, 0, 0], sizes = [2, 1, 256], strides = [1, 1, 1]} : vector<2x4x256xf32> to vector<2x1x256xf32>
    %c28 = arith.constant 28 : index
    %156 = memref.load %arg2[%c28] : memref<32xf32, #tpu.memory_space<smem>>
    %157 = vector.broadcast %156 : f32 to vector<2x1x256xf32>
    %158 = arith.mulf %155, %157 : vector<2x1x256xf32>
    %c7_10 = arith.constant 7 : index
    %159 = memref.load %arg3[%c7_10] : memref<8xf32, #tpu.memory_space<smem>>
    %160 = vector.broadcast %159 : f32 to vector<2x1x256xf32>
    %161 = arith.addf %158, %160 : vector<2x1x256xf32>
    %162 = vector.extract_strided_slice %0 {offsets = [0, 1, 0], sizes = [2, 1, 256], strides = [1, 1, 1]} : vector<2x4x256xf32> to vector<2x1x256xf32>
    %c29 = arith.constant 29 : index
    %163 = memref.load %arg2[%c29] : memref<32xf32, #tpu.memory_space<smem>>
    %164 = vector.broadcast %163 : f32 to vector<2x1x256xf32>
    %165 = arith.mulf %162, %164 : vector<2x1x256xf32>
    %166 = arith.addf %161, %165 : vector<2x1x256xf32>
    %167 = vector.extract_strided_slice %0 {offsets = [0, 2, 0], sizes = [2, 1, 256], strides = [1, 1, 1]} : vector<2x4x256xf32> to vector<2x1x256xf32>
    %c30 = arith.constant 30 : index
    %168 = memref.load %arg2[%c30] : memref<32xf32, #tpu.memory_space<smem>>
    %169 = vector.broadcast %168 : f32 to vector<2x1x256xf32>
    %170 = arith.mulf %167, %169 : vector<2x1x256xf32>
    %171 = arith.addf %166, %170 : vector<2x1x256xf32>
    %172 = vector.extract_strided_slice %0 {offsets = [0, 3, 0], sizes = [2, 1, 256], strides = [1, 1, 1]} : vector<2x4x256xf32> to vector<2x1x256xf32>
    %c31 = arith.constant 31 : index
    %173 = memref.load %arg2[%c31] : memref<32xf32, #tpu.memory_space<smem>>
    %174 = vector.broadcast %173 : f32 to vector<2x1x256xf32>
    %175 = arith.mulf %172, %174 : vector<2x1x256xf32>
    %176 = arith.addf %171, %175 : vector<2x1x256xf32>
    %177 = tpu.concatenate %22, %44, %66, %88, %110, %132, %154, %176 in 1 : vector<2x1x256xf32>, vector<2x1x256xf32>, vector<2x1x256xf32>, vector<2x1x256xf32>, vector<2x1x256xf32>, vector<2x1x256xf32>, vector<2x1x256xf32>, vector<2x1x256xf32> -> vector<2x8x256xf32>
    %c0_11 = arith.constant 0 : index
    %c0_12 = arith.constant 0 : index
    %c0_13 = arith.constant 0 : index
    %178 = vector.load %arg5[%c0_11, %c0_12, %c0_13] : memref<2x8x256xf32, #tpu.memory_space<vmem>>, vector<2x8x256xf32>
    tpu.vector_store %arg5[%c0_11, %c0_12, %c0_13], %177 {strides = array<i32>} : memref<2x8x256xf32, #tpu.memory_space<vmem>>, vector<2x8x256xf32>,
    return
  }
  func.func @transform_0(%arg0: i32, %arg1: i32) -> i32 {
    %c0_i32 = arith.constant 0 : i32
    %c0_i32_0 = arith.constant 0 : i32
    return %c0_i32 : i32
  }
  func.func @transform_1(%arg0: i32, %arg1: i32) -> i32 {
    %c0_i32 = arith.constant 0 : i32
    %c0_i32_0 = arith.constant 0 : i32
    return %c0_i32 : i32
  }
  func.func @transform_2(%arg0: i32, %arg1: i32) -> (i32, i32, i32) {
    %c0_i32 = arith.constant 0 : i32
    %c0_i32_0 = arith.constant 0 : i32
    return %arg0, %c0_i32, %arg1 : i32, i32, i32
  }
  func.func @transform_3(%arg0: i32, %arg1: i32) -> (i32, i32, i32) {
    %c0_i32 = arith.constant 0 : i32
    %c0_i32_0 = arith.constant 0 : i32
    return %arg0, %c0_i32, %arg1 : i32, i32, i32
  }
}

</mosaic_0001>

<bundles_post_ra>
// kernel: tpu_custom_call.1
= control target key start
LH: loop header
LB: loop body
LE: loop exit
PB: predicated region body
PF: predicated region fallthrough
CT: control target
= control target key end

     0   :  { %8 = vsyncpa [#allocation5], 0  ;;  %s1183_s0 = inlined_call_operand.hbm [shape: f32[32], index: 0, kind: input, shape index: {}]   ;;  %s1184_s1 = inlined_call_operand.vmem [shape: f32[8], index: 1, kind: input, shape index: {}]   ;;  %s1185_s2 = inlined_call_operand.hbm [shape: f32[2,4,256], index: 2, kind: input, shape index: {}]   ;;  %s1186_s3 = inlined_call_operand.hbm [shape: f32[2,8,256], index: 3, kind: output, shape index: {}]  }
   0x1   :  { %9 = vsyncpa [#allocation6], 0 }
   0x2   :  { %10 = vsyncpa [#allocation3], 0 }
   0x3   :  { %11 = vsyncpa [#allocation4], 0  ;;  %s26_s14 = sshll.u32 %s1184_s1, 4  ;;  %s850_s15 = smov [#allocation2]   ;;  %s27_s14 = int_to_ptr.vmem [resolvable:$true] %s26_s14 }
   0x4   :  { %19 = dma.hbm_to_smem %s1183_s0, 16, %s850_s15, [#allocation5]  }
   0x5   :  { %s790_s18 = scalar_lea.vmem %s27_s14, 16  ;;  %p795_p1 = scmp.lt.s32.totalorder %s27_s14, %s27_s14 }
   0x6   :  { %p791_p0 = scmp.ne.s32.totalorder %s27_s14, %s790_s18  ;;  %p796_p2 = scmp.lt.s32.totalorder %s790_s18, %s790_s18 }
   0x8   :  { %p797_p3 = por %p796_p2, %p795_p1 }
   0xa   :  { %p798_p4 = pnand %p797_p3, %p791_p0 }
   0xc   :  { %801 = shalt.err (!%p798_p4)
}
   0xd   :  { %s851_s19 = smov [#allocation7]   ;;  %s852_s20 = smov [#allocation8]  }
   0xe   :  { %29 = dma.vmem_to_smem %s27_s14, 16, %s851_s19, [#allocation6]  }
   0xf   :  { %s35_s21 = sshll.u32 %s852_s20, 4  ;;  %s36_s21 = int_to_ptr.vmem [resolvable:$true] %s35_s21 }
  0x10   :  { %s810_s22 = scalar_lea.vmem %s36_s21, 256  ;;  %p815_p6 = scmp.lt.s32.totalorder %s36_s21, %s36_s21 }
  0x11   :  { %p811_p5 = scmp.ne.s32.totalorder %s36_s21, %s810_s22  ;;  %p816_p7 = scmp.lt.s32.totalorder %s810_s22, %s810_s22 }
  0x13   :  { %p817_p8 = por %p816_p7, %p815_p6 }
  0x15   :  { %p818_p9 = pnand %p817_p8, %p811_p5 }
  0x17   :  { %821 = shalt.err (!%p818_p9)
}
  0x18   :  { %s853_s0 = smov 128   ;;  %s854_s1 = smov 8  }
  0x19   :  { %41 = dma.hbm_to_vmem [thread:$0]  %s1185_s2, 256, %s36_s21, [#allocation3], %s853_s0, %s853_s0, %s854_s1  }
  0x1a   :  { %842 = dma.done.wait [#allocation5], 16  }
  0x1b   :  { %843 = vsyncadd [#allocation5], 4294967280 }
  0x1c   :  { %844 = dma.done.wait [#allocation6], 16  }
  0x1d   :  { %845 = vsyncadd [#allocation6], 4294967280 }
  0x1e   :  { %846 = dma.done.wait [#allocation3], 256  }
  0x1f   :  { %847 = vsyncadd [#allocation3], 4294967040 }
  0x20   :  { %51 = sfence }
  0x21   :  { %s54_s25 = sld [smem:[#allocation2]]  ;;  %v456_v0 = vlaneseq  ;;  %v887_v1 = vld [vmem:[#allocation8] sm:$0xff]  ;;  %v889_v2 = vld [vmem:[#allocation8 + $0x8] sm:$0xff]  ;;  %vm630_vm0 = vcmask 1040384   ;;  %vm635_vm1 = vcmask 1041408   ;;  %vm640_vm2 = vcmask 1042432  }
  0x22   :  { %s58_s26 = sld [smem:[#allocation7]]  ;;  %vm645_vm3 = vcmask 1043456   ;;  %vm650_vm4 = vcmask 1044480   ;;  %vm655_vm5 = vcmask 1045504   ;;  %vm660_vm6 = vcmask 1046528  }
  0x23   :  { %s688_s27 = sld [smem:[#allocation2 + $0x1]]  ;;  %v457_v4 = vshrl.u32 %v456_v0, 7 }
  0x24   :  { %s691_s28 = sld [smem:[#allocation2 + $0x2]] }
  0x25   :  { %s694_s29 = sld [smem:[#allocation2 + $0x3]]  ;;  %v907_v15 = vsub.s32 0, %v457_v4  ;;  %v909_v16 = vsub.s32 4, %v457_v4 }
  0x26   :  { %s891_s30 = sld [smem:[#allocation2 + $0x4]] }
  0x27   :  { %v55_v3 = vstv %s54_s25  ;;  %s893_s2 = sld [smem:[#allocation7 + $0x1]] }
  0x28   :  { %v56_v5 = vmul.f32 %v55_v3, %v887_v1  ;;  %v57_v6 = vmul.f32 %v55_v3, %v889_v2  ;;  %v59_v7 = vstv %s58_s26  ;;  %s897_s4 = sld [smem:[#allocation2 + $0x5]] }
  0x29   :  { %v63_v8 = vstv %s688_s27  ;;  %s899_s5 = sld [smem:[#allocation2 + $0x6]] }
  0x2a   :  { %v60_v9 = vadd.f32 %v59_v7, %v56_v5  ;;  %v61_v10 = vadd.f32 %v59_v7, %v57_v6  ;;  %v64_v11 = vmul.f32 %v63_v8, %v887_v1  ;;  %v65_v12 = vmul.f32 %v63_v8, %v889_v2  ;;  %s903_s6 = sld [smem:[#allocation2 + $0x7]] }
  0x2b   :  { %v77_v13 = vstv %s691_s28  ;;  %v91_v14 = vstv %s694_s29  ;;  %s905_s7 = sld [smem:[#allocation2 + $0x8]] }
  0x2c   :  { %v689_v17 = vrot.slane %v64_v11, 9  ;;  %v690_v18 = vrot.slane %v65_v12, 9  ;;  %v78_v19 = vmul.f32 %v77_v13, %v887_v1  ;;  %v79_v20 = vmul.f32 %v77_v13, %v889_v2  ;;  %s917_s8 = sld [smem:[#allocation7 + $0x2]] }
  0x2d   :  { %v92_v21 = vmul.f32 %v91_v14, %v887_v1  ;;  %v93_v22 = vmul.f32 %v91_v14, %v889_v2  ;;  %v105_v23 = vstv %s891_s30  ;;  %v109_v24 = vstv %s893_s2  ;;  %s919_s9 = sld [smem:[#allocation2 + $0x9]] }
  0x2e   :  { %v74_v25 = vadd.f32 %v689_v17, %v60_v9  ;;  %v75_v26 = vadd.f32 %v690_v18, %v61_v10  ;;  %v692_v27 = vrot.slane %v78_v19, 10  ;;  %v693_v28 = vrot.slane %v79_v20, 10  ;;  %s923_s10 = sld [smem:[#allocation2 + $0xa]] }
  0x2f   :  { %v695_v29 = vrot.slane %v92_v21, 11  ;;  %v696_v30 = vrot.slane %v93_v22, 11  ;;  %v106_v31 = vmul.f32 %v105_v23, %v887_v1  ;;  %v107_v32 = vmul.f32 %v105_v23, %v889_v2  ;;  %s927_s11 = sld [smem:[#allocation2 + $0xb]] }
  0x30   :  { %v88_v33 = vadd.f32 %v692_v27, %v74_v25  ;;  %v89_v34 = vadd.f32 %v693_v28, %v75_v26  ;;  %v113_v35 = vstv %s897_s4  ;;  %v127_v36 = vstv %s899_s5  ;;  %s937_s12 = sld [smem:[#allocation2 + $0xc]] }
  0x31   :  { %v110_v37 = vadd.f32 %v109_v24, %v106_v31  ;;  %v111_v38 = vadd.f32 %v109_v24, %v107_v32  ;;  %v114_v39 = vmul.f32 %v113_v35, %v887_v1  ;;  %v115_v40 = vmul.f32 %v113_v35, %v889_v2  ;;  %s941_s13 = sld [smem:[#allocation7 + $0x3]] }
  0x32   :  { %v931_v41 = vadd.f32 %v695_v29, %v88_v33  ;;  %v933_v42 = vadd.f32 %v696_v30, %v89_v34  ;;  %v128_v43 = vmul.f32 %v127_v36, %v887_v1  ;;  %v129_v44 = vmul.f32 %v127_v36, %v889_v2  ;;  %s945_s14 = sld [smem:[#allocation2 + $0xd]] }
  0x33   :  { %v700_v45 = vrot.slane %v114_v39, 9  ;;  %v701_v46 = vrot.slane %v115_v40, 9  ;;  %v141_v47 = vstv %s903_s6  ;;  %v155_v48 = vstv %s905_s7  ;;  %s949_s15 = sld [smem:[#allocation2 + $0xe]]  ;;  %s855_s7 = smov [#allocation9]  }
  0x34   :  { %v703_v49 = vrot.slane %v128_v43, 10  ;;  %v704_v50 = vrot.slane %v129_v44, 10  ;;  %v142_v51 = vmul.f32 %v141_v47, %v887_v1  ;;  %v143_v52 = vmul.f32 %v141_v47, %v889_v2  ;;  %s957_s16 = sld [smem:[#allocation2 + $0xf]] }
  0x35   :  { %v124_v53 = vadd.f32 %v700_v45, %v110_v37  ;;  %v125_v54 = vadd.f32 %v701_v46, %v111_v38  ;;  %v156_v55 = vmul.f32 %v155_v48, %v887_v1  ;;  %v157_v56 = vmul.f32 %v155_v48, %v889_v2  ;;  %s965_s17 = sld [smem:[#allocation2 + $0x10]] }
  0x36   :  { %v706_v57 = vrot.slane %v142_v51, 11  ;;  %v707_v58 = vrot.slane %v143_v52, 11  ;;  %v159_v59 = vstv %s917_s8  ;;  %v163_v60 = vstv %s919_s9  ;;  %s969_s18 = sld [smem:[#allocation7 + $0x4]]  ;;  %s674_s8 = sshll.u32 %s855_s7, 4  ;;  %s675_s8 = int_to_ptr.vmem [resolvable:$true] %s674_s8 }
  0x37   :  { %v138_v61 = vadd.f32 %v703_v49, %v124_v53  ;;  %v139_v62 = vadd.f32 %v704_v50, %v125_v54  ;;  %v160_v63 = vadd.f32 %v159_v59, %v156_v55  ;;  %v161_v0 = vadd.f32 %v159_v59, %v157_v56  ;;  %s973_s19 = sld [smem:[#allocation2 + $0x11]]  ;;  %s822_s9 = scalar_lea.vmem %s675_s8, 512 }
  0x38   :  { %v164_v3 = vmul.f32 %v163_v60, %v887_v1  ;;  %v165_v4 = vmul.f32 %v163_v60, %v889_v2  ;;  %v177_v5 = vstv %s923_s10  ;;  %v191_v6 = vstv %s927_s11  ;;  %s979_s20 = sld [smem:[#allocation2 + $0x12]]  ;;  %p823_p10 = scmp.ne.s32.totalorder %s675_s8, %s822_s9 }
  0x39   :  { %v959_v7 = vadd.f32 %v706_v57, %v138_v61  ;;  %v961_v8 = vadd.f32 %v707_v58, %v139_v62  ;;  %v178_v9 = vmul.f32 %v177_v5, %v887_v1  ;;  %v179_v10 = vmul.f32 %v177_v5, %v889_v2  ;;  %s983_s21 = sld [smem:[#allocation2 + $0x13]]  ;;  %p827_p11 = scmp.lt.s32.totalorder %s675_s8, %s675_s8 }
  0x3a   :  { %v711_v11 = vrot.slane %v164_v3, 9  ;;  %v712_v12 = vrot.slane %v165_v4, 9  ;;  %v192_v13 = vmul.f32 %v191_v6, %v887_v1  ;;  %v193_v14 = vmul.f32 %v191_v6, %v889_v2  ;;  %s987_s22 = sld [smem:[#allocation2 + $0x14]]  ;;  %p828_p12 = scmp.lt.s32.totalorder %s822_s9, %s822_s9 }
  0x3b   :  { %v714_v17 = vrot.slane %v178_v9, 10  ;;  %v715_v18 = vrot.slane %v179_v10, 10  ;;  %v205_v19 = vstv %s937_s12  ;;  %v209_v20 = vstv %s941_s13  ;;  %s993_s0 = sld [smem:[#allocation7 + $0x5]] }
  0x3c   :  { %v174_v21 = vadd.f32 %v711_v11, %v160_v63  ;;  %v175_v22 = vadd.f32 %v712_v12, %v161_v0  ;;  %v717_v23 = vrot.slane %v192_v13, 11  ;;  %v718_v24 = vrot.slane %v193_v14, 11  ;;  %s999_s1 = sld [smem:[#allocation2 + $0x15]]  ;;  %p829_p13 = por %p828_p12, %p827_p11 }
  0x3d   :  { %v206_v25 = vmul.f32 %v205_v19, %v887_v1  ;;  %v207_v26 = vmul.f32 %v205_v19, %v889_v2  ;;  %v213_v27 = vstv %s945_s14  ;;  %v227_v28 = vstv %s949_s15  ;;  %s1005_s23 = sld [smem:[#allocation2 + $0x16]] }
  0x3e   :  { %v188_v29 = vadd.f32 %v714_v17, %v174_v21  ;;  %v189_v30 = vadd.f32 %v715_v18, %v175_v22  ;;  %v214_v31 = vmul.f32 %v213_v27, %v887_v1  ;;  %v215_v32 = vmul.f32 %v213_v27, %v889_v2  ;;  %s1009_s24 = sld [smem:[#allocation2 + $0x17]]  ;;  %p830_p0 = pnand %p829_p13, %p823_p10 }
  0x3f   :  { %v210_v33 = vadd.f32 %v209_v20, %v206_v25  ;;  %v211_v34 = vadd.f32 %v209_v20, %v207_v26  ;;  %v228_v35 = vmul.f32 %v227_v28, %v887_v1  ;;  %v229_v36 = vmul.f32 %v227_v28, %v889_v2  ;;  %s1017_s25 = sld [smem:[#allocation2 + $0x18]] }
  0x40   :  { %v989_v37 = vadd.f32 %v717_v23, %v188_v29  ;;  %v991_v38 = vadd.f32 %v718_v24, %v189_v30  ;;  %v722_v39 = vrot.slane %v214_v31, 9  ;;  %v723_v40 = vrot.slane %v215_v32, 9  ;;  %s1025_s26 = sld [smem:[#allocation7 + $0x6]] }
  0x41   :  { %v725_v43 = vrot.slane %v228_v35, 10  ;;  %v726_v44 = vrot.slane %v229_v36, 10  ;;  %v241_v45 = vstv %s957_s16  ;;  %v255_v46 = vstv %s965_s17  ;;  %s1027_s27 = sld [smem:[#allocation2 + $0x19]] }
  0x42   :  { %v224_v47 = vadd.f32 %v722_v39, %v210_v33  ;;  %v225_v48 = vadd.f32 %v723_v40, %v211_v34  ;;  %v242_v49 = vmul.f32 %v241_v45, %v887_v1  ;;  %v243_v50 = vmul.f32 %v241_v45, %v889_v2  ;;  %s1031_s28 = sld [smem:[#allocation2 + $0x1a]] }
  0x43   :  { %v256_v51 = vmul.f32 %v255_v46, %v887_v1  ;;  %v257_v52 = vmul.f32 %v255_v46, %v889_v2  ;;  %v259_v53 = vstv %s969_s18  ;;  %v263_v54 = vstv %s973_s19  ;;  %s1035_s29 = sld [smem:[#allocation2 + $0x1b]] }
  0x44   :  { %v238_v55 = vadd.f32 %v725_v43, %v224_v47  ;;  %v239_v56 = vadd.f32 %v726_v44, %v225_v48  ;;  %v728_v57 = vrot.slane %v242_v49, 11  ;;  %v729_v58 = vrot.slane %v243_v50, 11  ;;  %s1045_s30 = sld [smem:[#allocation2 + $0x1c]] }
  0x45   :  { %v260_v59 = vadd.f32 %v259_v53, %v256_v51  ;;  %v261_v60 = vadd.f32 %v259_v53, %v257_v52  ;;  %v264_v61 = vmul.f32 %v263_v54, %v887_v1  ;;  %v265_v62 = vmul.f32 %v263_v54, %v889_v2  ;;  %s1049_s2 = sld [smem:[#allocation7 + $0x7]] }
  0x46   :  { %v1011_v63 = vadd.f32 %v728_v57, %v238_v55  ;;  %v1013_v0 = vadd.f32 %v729_v58, %v239_v56  ;;  %v277_v3 = vstv %s979_s20  ;;  %v291_v4 = vstv %s983_s21  ;;  %s1053_s4 = sld [smem:[#allocation2 + $0x1d]] }
  0x47   :  { %v733_v5 = vrot.slane %v264_v61, 9  ;;  %v734_v6 = vrot.slane %v265_v62, 9  ;;  %v278_v9 = vmul.f32 %v277_v3, %v887_v1  ;;  %v279_v10 = vmul.f32 %v277_v3, %v889_v2  ;;  %s1057_s5 = sld [smem:[#allocation2 + $0x1e]] }
  0x48   :  { %v292_v11 = vmul.f32 %v291_v4, %v887_v1  ;;  %v293_v12 = vmul.f32 %v291_v4, %v889_v2  ;;  %v305_v13 = vstv %s987_s22  ;;  %v309_v14 = vstv %s993_s0  ;;  %s1071_s6 = sld [smem:[#allocation2 + $0x1f]] }
  0x49   :  { %v274_v17 = vadd.f32 %v733_v5, %v260_v59  ;;  %v275_v18 = vadd.f32 %v734_v6, %v261_v60  ;;  %v736_v19 = vrot.slane %v278_v9, 10  ;;  %v737_v20 = vrot.slane %v279_v10, 10 }
  0x4a   :  { %v739_v21 = vrot.slane %v292_v11, 11  ;;  %v740_v22 = vrot.slane %v293_v12, 11  ;;  %v306_v23 = vmul.f32 %v305_v13, %v887_v1  ;;  %v307_v24 = vmul.f32 %v305_v13, %v889_v2 }
  0x4b   :  { %v288_v25 = vadd.f32 %v736_v19, %v274_v17  ;;  %v289_v26 = vadd.f32 %v737_v20, %v275_v18  ;;  %v313_v27 = vstv %s999_s1  ;;  %v327_v28 = vstv %s1005_s23 }
  0x4c   :  { %v310_v29 = vadd.f32 %v309_v14, %v306_v23  ;;  %v311_v30 = vadd.f32 %v309_v14, %v307_v24  ;;  %v314_v31 = vmul.f32 %v313_v27, %v887_v1  ;;  %v315_v32 = vmul.f32 %v313_v27, %v889_v2 }
  0x4d   :  { %v1039_v33 = vadd.f32 %v739_v21, %v288_v25  ;;  %v1041_v34 = vadd.f32 %v740_v22, %v289_v26  ;;  %v328_v35 = vmul.f32 %v327_v28, %v887_v1  ;;  %v329_v36 = vmul.f32 %v327_v28, %v889_v2 }
  0x4e   :  { %v744_v39 = vrot.slane %v314_v31, 9  ;;  %v745_v40 = vrot.slane %v315_v32, 9  ;;  %v341_v43 = vstv %s1009_s24  ;;  %v355_v44 = vstv %s1017_s25 }
  0x4f   :  { %v747_v45 = vrot.slane %v328_v35, 10  ;;  %v748_v46 = vrot.slane %v329_v36, 10  ;;  %v342_v47 = vmul.f32 %v341_v43, %v887_v1  ;;  %v343_v48 = vmul.f32 %v341_v43, %v889_v2 }
  0x50   :  { %v324_v49 = vadd.f32 %v744_v39, %v310_v29  ;;  %v325_v50 = vadd.f32 %v745_v40, %v311_v30  ;;  %v356_v51 = vmul.f32 %v355_v44, %v887_v1  ;;  %v357_v52 = vmul.f32 %v355_v44, %v889_v2 }
  0x51   :  { %v750_v53 = vrot.slane %v342_v47, 11  ;;  %v751_v54 = vrot.slane %v343_v48, 11  ;;  %v359_v55 = vstv %s1025_s26  ;;  %v363_v56 = vstv %s1027_s27 }
  0x52   :  { %v338_v57 = vadd.f32 %v747_v45, %v324_v49  ;;  %v339_v58 = vadd.f32 %v748_v46, %v325_v50  ;;  %v360_v59 = vadd.f32 %v359_v55, %v356_v51  ;;  %v361_v60 = vadd.f32 %v359_v55, %v357_v52 }
  0x53   :  { %v364_v61 = vmul.f32 %v363_v56, %v887_v1  ;;  %v365_v62 = vmul.f32 %v363_v56, %v889_v2  ;;  %v377_v3 = vstv %s1031_s28  ;;  %v391_v4 = vstv %s1035_s29 }
  0x54   :  { %v1065_v5 = vadd.f32 %v750_v53, %v338_v57  ;;  %v1067_v6 = vadd.f32 %v751_v54, %v339_v58  ;;  %v378_v9 = vmul.f32 %v377_v3, %v887_v1  ;;  %v379_v10 = vmul.f32 %v377_v3, %v889_v2 }
  0x55   :  { %v755_v11 = vrot.slane %v364_v61, 9  ;;  %v756_v12 = vrot.slane %v365_v62, 9  ;;  %v392_v13 = vmul.f32 %v391_v4, %v887_v1  ;;  %v393_v14 = vmul.f32 %v391_v4, %v889_v2 }
  0x56   :  { %v758_v17 = vrot.slane %v378_v9, 10  ;;  %v759_v18 = vrot.slane %v379_v10, 10  ;;  %v405_v19 = vstv %s1045_s30  ;;  %v409_v20 = vstv %s1049_s2 }
  0x57   :  { %v374_v21 = vadd.f32 %v755_v11, %v360_v59  ;;  %v375_v22 = vadd.f32 %v756_v12, %v361_v60  ;;  %v761_v23 = vrot.slane %v392_v13, 11  ;;  %v762_v24 = vrot.slane %v393_v14, 11 }
  0x58   :  { %v406_v25 = vmul.f32 %v405_v19, %v887_v1  ;;  %v407_v26 = vmul.f32 %v405_v19, %v889_v2  ;;  %v413_v27 = vstv %s1053_s4  ;;  %v427_v28 = vstv %s1057_s5 }
  0x59   :  { %v388_v29 = vadd.f32 %v758_v17, %v374_v21  ;;  %v389_v30 = vadd.f32 %v759_v18, %v375_v22  ;;  %v414_v31 = vmul.f32 %v413_v27, %v887_v1  ;;  %v415_v32 = vmul.f32 %v413_v27, %v889_v2 }
  0x5a   :  { %v410_v35 = vadd.f32 %v409_v20, %v406_v25  ;;  %v411_v36 = vadd.f32 %v409_v20, %v407_v26  ;;  %v428_v39 = vmul.f32 %v427_v28, %v887_v1  ;;  %v429_v40 = vmul.f32 %v427_v28, %v889_v2 }
  0x5b   :  { %v1085_v43 = vadd.f32 %v761_v23, %v388_v29  ;;  %v1087_v44 = vadd.f32 %v762_v24, %v389_v30  ;;  %v766_v45 = vrot.slane %v414_v31, 9  ;;  %v767_v46 = vrot.slane %v415_v32, 9 }
  0x5c   :  { %v769_v47 = vrot.slane %v428_v39, 10  ;;  %v770_v48 = vrot.slane %v429_v40, 10  ;;  %v441_v49 = vstv %s1071_s6  ;;  %v459_v50 = vrot.slane %v931_v41, %v907_v15 }
  0x5d   :  { %v424_v51 = vadd.f32 %v766_v45, %v410_v35  ;;  %v425_v52 = vadd.f32 %v767_v46, %v411_v36  ;;  %v442_v53 = vmul.f32 %v441_v49, %v887_v1  ;;  %v443_v54 = vmul.f32 %v441_v49, %v889_v2 }
  0x5e   :  { %v463_v55 = vrot.slane %v931_v41, %v909_v16  ;;  %v467_v56 = vrot.slane %v933_v42, %v907_v15  ;;  %v471_v57 = vrot.slane %v933_v42, %v909_v16  ;;  %v481_v58 = vrot.slane %v959_v7, %v907_v15 }
  0x5f   :  { %v438_v59 = vadd.f32 %v769_v47, %v424_v51  ;;  %v439_v60 = vadd.f32 %v770_v48, %v425_v52  ;;  %v772_v61 = vrot.slane %v442_v53, 11  ;;  %v773_v1 = vrot.slane %v443_v54, 11 }
  0x60   :  { %v485_v2 = vrot.slane %v959_v7, %v909_v16  ;;  %v489_v41 = vrot.slane %v961_v8, %v907_v15  ;;  %v493_v62 = vrot.slane %v961_v8, %v909_v16  ;;  %v503_v42 = vrot.slane %v989_v37, %v907_v15 }
  0x61   :  { %v452_v3 = vadd.f32 %v772_v61, %v438_v59  ;;  %v453_v4 = vadd.f32 %v773_v1, %v439_v60  ;;  %v507_v9 = vrot.slane %v989_v37, %v909_v16  ;;  %v511_v10 = vrot.slane %v991_v38, %v907_v15 }
  0x62   :  { %v515_v7 = vrot.slane %v991_v38, %v909_v16  ;;  %v525_v11 = vrot.slane %v1011_v63, %v907_v15  ;;  %v529_v8 = vrot.slane %v1011_v63, %v909_v16  ;;  %v533_v12 = vrot.slane %v1013_v0, %v907_v15 }
  0x63   :  { %v537_v37 = vrot.slane %v1013_v0, %v909_v16  ;;  %v547_v13 = vrot.slane %v1039_v33, %v907_v15  ;;  %v551_v14 = vrot.slane %v1039_v33, %v909_v16  ;;  %v555_v38 = vrot.slane %v1041_v34, %v907_v15 }
  0x64   :  { %v559_v17 = vrot.slane %v1041_v34, %v909_v16  ;;  %v569_v63 = vrot.slane %v1065_v5, %v907_v15  ;;  %v573_v18 = vrot.slane %v1065_v5, %v909_v16  ;;  %v577_v0 = vrot.slane %v1067_v6, %v907_v15 }
  0x65   :  { %v581_v19 = vrot.slane %v1067_v6, %v909_v16  ;;  %v591_v33 = vrot.slane %v1085_v43, %v907_v15  ;;  %v595_v20 = vrot.slane %v1085_v43, %v909_v16  ;;  %v599_v34 = vrot.slane %v1087_v44, %v907_v15 }
  0x66   :  { %v603_v21 = vrot.slane %v1087_v44, %v909_v16  ;;  %v613_v5 = vrot.slane %v452_v3, %v907_v15  ;;  %v617_v22 = vrot.slane %v452_v3, %v909_v16  ;;  %v621_v23 = vrot.slane %v453_v4, %v907_v15 }
  0x67   :  { %v625_v6 = vrot.slane %v453_v4, %v909_v16  ;;  %v631_v24 = vsel %vm630_vm0, %v459_v50, %v481_v58  ;;  %v632_v25 = vsel %vm630_vm0, %v463_v55, %v485_v2  ;;  %v633_v26 = vsel %vm630_vm0, %v467_v56, %v489_v41 }
  0x68   :  { %v634_v27 = vsel %vm630_vm0, %v471_v57, %v493_v62  ;;  %v636_v28 = vsel %vm635_vm1, %v631_v24, %v503_v42  ;;  %v637_v29 = vsel %vm635_vm1, %v632_v25, %v507_v9  ;;  %v638_v30 = vsel %vm635_vm1, %v633_v26, %v511_v10 }
  0x69   :  { %v639_v31 = vsel %vm635_vm1, %v634_v27, %v515_v7  ;;  %v641_v15 = vsel %vm640_vm2, %v636_v28, %v525_v11  ;;  %v642_v16 = vsel %vm640_vm2, %v637_v29, %v529_v8  ;;  %v643_v32 = vsel %vm640_vm2, %v638_v30, %v533_v12 }
  0x6a   :  { %v644_v35 = vsel %vm640_vm2, %v639_v31, %v537_v37  ;;  %v646_v36 = vsel %vm645_vm3, %v641_v15, %v547_v13  ;;  %v647_v39 = vsel %vm645_vm3, %v642_v16, %v551_v14  ;;  %v648_v40 = vsel %vm645_vm3, %v643_v32, %v555_v38 }
  0x6b   :  { %v649_v43 = vsel %vm645_vm3, %v644_v35, %v559_v17  ;;  %v651_v44 = vsel %vm650_vm4, %v646_v36, %v569_v63  ;;  %v652_v45 = vsel %vm650_vm4, %v647_v39, %v573_v18  ;;  %v653_v46 = vsel %vm650_vm4, %v648_v40, %v577_v0 }
  0x6c   :  { %v654_v47 = vsel %vm650_vm4, %v649_v43, %v581_v19  ;;  %v656_v48 = vsel %vm655_vm5, %v651_v44, %v591_v33  ;;  %v657_v49 = vsel %vm655_vm5, %v652_v45, %v595_v20  ;;  %v658_v50 = vsel %vm655_vm5, %v653_v46, %v599_v34 }
  0x6d   :  { %v659_v51 = vsel %vm655_vm5, %v654_v47, %v603_v21  ;;  %v661_v52 = vsel %vm660_vm6, %v656_v48, %v613_v5  ;;  %v662_v53 = vsel %vm660_vm6, %v657_v49, %v617_v22  ;;  %v663_v54 = vsel %vm660_vm6, %v658_v50, %v621_v23 }
  0x6e   :  { %v664_v55 = vsel %vm660_vm6, %v659_v51, %v625_v6  ;;  %665 = vst [vmem:[#allocation9] sm:$0xff] %v661_v52  ;;  %666 = vst [vmem:[#allocation9 + $0x8] sm:$0xff] %v662_v53 }
  0x6f   :  { %667 = vst [vmem:[#allocation9 + $0x10] sm:$0xff] %v663_v54  ;;  %668 = vst [vmem:[#allocation9 + $0x18] sm:$0xff] %v664_v55 }
  0x70   :  { %833 = shalt.err (!%p830_p0)
}
  0x71   :  { %s856_s10 = smov 256   ;;  %s857_s11 = smov 16  }
  0x72   :  { %680 = dma.vmem_to_hbm [thread:$0]  %s675_s8, 512, %s1186_s3, [#allocation4], %s856_s10, %s856_s10, %s857_s11  }
  0x73   :  { %848 = dma.done.wait [#allocation4], 512  }
  0x74   :  { %849 = vsyncadd [#allocation4], 4294966784 }
  0x75   :  { %684 = vsyncpa [#allocation3], 1 }
  0x76   :  { %685 = vsyncpa [#allocation4], 1 }
  0x77   :  { %686 = vsyncpa [#allocation5], 1 }
  0x78   :  { %687 = vsyncpa [#allocation6], 1 }

</bundles_post_ra>
